<compile_context>
chip_gen: v6e
topology: v6e:2x2x1
jax: 0.10.0
libtpu: 0.0.40
codegen_flags: <defaults>
</compile_context>

<pallas_src>
import functools

import jax
import jax.numpy as jnp
from jax.experimental import pallas as pl
from jax.experimental.pallas import tpu as pltpu

IN_DIM = 28 * 28      # 784
HID = 64              # logical hidden width
HID_PAD = 128         # lane-dense hidden width
NCLS = 10             # logical classes
NCLS_PAD = 128        # lane-dense output width
NEG_PAD = -1e30       # padded-logit bias; exp(NEG_PAD - m) underflows to 0

_MIN_BATCH_FOR_TWO_STEPS = 256   # force >=2 grid steps (v7x: 2 TCs) above this


def _round_up(x, m):
    return ((x + m - 1) // m) * m


def mlp_kernel(x_ref,
               w1_ref, b1_ref,
               w2_ref, b2_ref,
               w3_ref, b3_ref,
               w4_ref, b4_ref,
               o_ref):
    f32 = jnp.float32
    bf16 = jnp.bfloat16

    x = x_ref[...]                                            # (TB, 784) bf16

    # fc1 + relu   (TB,784)bf16 @ (784,128)bf16 -> f32 acc
    h = jnp.dot(x, w1_ref[...], preferred_element_type=f32) + b1_ref[...]
    h = jnp.maximum(h, 0.0).astype(bf16)
    # fc2 + relu   (TB,128) @ (128,128)
    h = jnp.dot(h, w2_ref[...], preferred_element_type=f32) + b2_ref[...]
    h = jnp.maximum(h, 0.0).astype(bf16)
    # fc3 + relu
    h = jnp.dot(h, w3_ref[...], preferred_element_type=f32) + b3_ref[...]
    h = jnp.maximum(h, 0.0).astype(bf16)
    # fc4 -> lane-dense (TB,128) f32 logits; cols >= 10 carry bias NEG_PAD
    logits = jnp.dot(h, w4_ref[...], preferred_element_type=f32) + b4_ref[...]

    # log_softmax over classes (f32). Padded columns are ~-1e30: they never
    # win the max and exp() underflows to exactly 0, so the normalizer equals
    # the 10-class one.
    m = jnp.max(logits, axis=1, keepdims=True)
    shifted = logits - m
    lse = jnp.log(jnp.sum(jnp.exp(shifted), axis=1, keepdims=True))
    o_ref[...] = shifted - lse


def _pad_params(params):
    """Zero-pad to lane-dense widths; weights bf16, biases f32 (fc4 pad=NEG_PAD)."""
    f32, bf16 = jnp.float32, jnp.bfloat16
    w1 = jnp.zeros((IN_DIM, HID_PAD), bf16).at[:, :HID].set(params["w1"].astype(bf16))
    b1 = jnp.zeros((1, HID_PAD), f32).at[:, :HID].set(params["b1"])
    w2 = jnp.zeros((HID_PAD, HID_PAD), bf16).at[:HID, :HID].set(params["w2"].astype(bf16))
    b2 = jnp.zeros((1, HID_PAD), f32).at[:, :HID].set(params["b2"])
    w3 = jnp.zeros((HID_PAD, HID_PAD), bf16).at[:HID, :HID].set(params["w3"].astype(bf16))
    b3 = jnp.zeros((1, HID_PAD), f32).at[:, :HID].set(params["b3"])
    w4 = jnp.zeros((HID_PAD, NCLS_PAD), bf16).at[:HID, :NCLS].set(params["w4"].astype(bf16))
    b4 = jnp.full((1, NCLS_PAD), NEG_PAD, f32).at[:, :NCLS].set(params["b4"])
    return (w1, b1, w2, b2, w3, b3, w4, b4)


def _choose_tiling(B, tb):
    """Pick (TB, Bp, n_steps) with bounded padding and >=2 steps when big."""
    B8 = _round_up(B, 8)
    n = pl.cdiv(B8, tb)                       # steps needed to keep tiles <= tb
    if B8 >= _MIN_BATCH_FOR_TWO_STEPS:        # feed both v7x TensorCores
        n = max(n, 2)
    if n > 1 and n % 2 == 1:                  # even step count: no tail imbalance
        n += 1
    TB = _round_up(pl.cdiv(B8, n), 8)         # near-equal tiles, sublane-aligned
    Bp = n * TB                               # padding bounded by ~8*n rows
    return TB, Bp, n


@functools.partial(jax.jit, static_argnames=("tb",))
def net_forward(x, params, *, tb=2048):
    """x: (B, 784); params: dict of (in,out) weights and (1,out) biases (f32)."""
    B, D = x.shape
    assert D == IN_DIM
    assert tb % 8 == 0

    # bf16 operands for the MXU; the x HBM->VMEM DMA is also bf16.
    x = x.astype(jnp.bfloat16)
    padded = _pad_params(params)

    TB, Bp, n = _choose_tiling(B, tb)
    if Bp != B:
        x = jnp.pad(x, ((0, Bp - B), (0, 0)))
    grid = (n,)

    # Weights/biases: full-array blocks with constant index_map -> grid
    # invariant (Mosaic does not re-fetch unchanged blocks).
    const = lambda i: (0, 0)
    w_spec = lambda shape: pl.BlockSpec(shape, const)
    in_specs = [
        pl.BlockSpec((TB, IN_DIM), lambda i: (i, 0)),          # x tile (bf16)
        w_spec((IN_DIM, HID_PAD)), w_spec((1, HID_PAD)),       # fc1
        w_spec((HID_PAD, HID_PAD)), w_spec((1, HID_PAD)),      # fc2
        w_spec((HID_PAD, HID_PAD)), w_spec((1, HID_PAD)),      # fc3
        w_spec((HID_PAD, NCLS_PAD)), w_spec((1, NCLS_PAD)),    # fc4
    ]
    out_spec = pl.BlockSpec((TB, NCLS_PAD), lambda i: (i, 0))

    flops = 2 * Bp * (IN_DIM * HID_PAD + 2 * HID_PAD * HID_PAD
                      + HID_PAD * NCLS_PAD)
    weight_bytes = 2 * (IN_DIM * HID_PAD + 2 * HID_PAD * HID_PAD
                        + HID_PAD * NCLS_PAD) + 4 * (3 * HID_PAD + NCLS_PAD)
    cost = pl.CostEstimate(
        flops=flops,
        transcendentals=2 * Bp * NCLS_PAD,  # exp + log in the softmax
        bytes_accessed=2 * Bp * IN_DIM + weight_bytes + 4 * Bp * NCLS_PAD,
    )

    out = pl.pallas_call(
        mlp_kernel,
        out_shape=jax.ShapeDtypeStruct((Bp, NCLS_PAD), jnp.float32),
        grid=grid,
        in_specs=in_specs,
        out_specs=out_spec,
        compiler_params=pltpu.CompilerParams(
            dimension_semantics=("parallel",),
            vmem_limit_bytes=32 * 1024 * 1024),
        cost_estimate=cost,
    )(x, *padded)

    return out[:B, :NCLS]


def init_params(key):
    """PyTorch nn.Linear-style init: U[-1/sqrt(fan_in), +1/sqrt(fan_in)]."""
    dims = [(IN_DIM, HID), (HID, HID), (HID, HID), (HID, NCLS)]
    params = {}
    for i, (fan_in, fan_out) in enumerate(dims, start=1):
        key, kw, kb = jax.random.split(key, 3)
        bound = 1.0 / (fan_in ** 0.5)
        params[f"w{i}"] = jax.random.uniform(
            kw, (fan_in, fan_out), jnp.float32, -bound, bound)
        params[f"b{i}"] = jax.random.uniform(
            kb, (1, fan_out), jnp.float32, -bound, bound)
    return params


def net_forward_ref_f32(x, params):
    """Pure f32 reference (matches the PyTorch module exactly)."""
    h = jnp.maximum(x @ params["w1"] + params["b1"], 0.0)
    h = jnp.maximum(h @ params["w2"] + params["b2"], 0.0)
    h = jnp.maximum(h @ params["w3"] + params["b3"], 0.0)
    logits = h @ params["w4"] + params["b4"]
    return jax.nn.log_softmax(logits, axis=1)


def net_forward_ref_bf16(x, params):
    """Reference that mimics the kernel's bf16 MXU operands / f32 accumulate."""
    f32, bf16 = jnp.float32, jnp.bfloat16
    q = lambda a: a.astype(bf16).astype(f32)   # bf16->f32 is exact
    h = jnp.maximum(q(x) @ q(params["w1"]) + params["b1"], 0.0)
    h = jnp.maximum(q(h) @ q(params["w2"]) + params["b2"], 0.0)
    h = jnp.maximum(q(h) @ q(params["w3"]) + params["b3"], 0.0)
    logits = q(h) @ q(params["w4"]) + params["b4"]
    return jax.nn.log_softmax(logits, axis=1)


if __name__ == "__main__":
    key = jax.random.PRNGKey(0)
    kx, kp = jax.random.split(key)
    params = init_params(kp)

    # Small-shape correctness check (single grid step).
    B = 8
    x = jax.random.normal(kx, (B, IN_DIM), jnp.float32)
    out = jax.block_until_ready(net_forward(x, params))
    assert out.shape == (B, NCLS)
    ref_bf16 = net_forward_ref_bf16(x, params)
    assert jnp.allclose(out, ref_bf16, atol=2e-3, rtol=2e-3)
    # Loose sanity vs the exact-f32 module semantics (bf16 operand rounding).
    ref_f32 = net_forward_ref_f32(x, params)
    assert jnp.allclose(out, ref_f32, atol=1e-1, rtol=1e-1)
    # log_softmax invariant: probabilities of the 10 real classes sum to 1.
    assert jnp.allclose(jnp.sum(jnp.exp(out), axis=1), 1.0, atol=1e-3)

    # Exercise the batch grid: multiple (even) tiles + non-multiple-of-8 B
    # (bounded pad/slice path) with a small tile size.
    B2 = 300
    x2 = jax.random.normal(jax.random.PRNGKey(1), (B2, IN_DIM), jnp.float32)
    out2 = jax.block_until_ready(net_forward(x2, params, tb=128))
    assert out2.shape == (B2, NCLS)
    ref2 = net_forward_ref_bf16(x2, params)
    assert jnp.allclose(out2, ref2, atol=2e-3, rtol=2e-3)
    assert jnp.allclose(jnp.sum(jnp.exp(out2), axis=1), 1.0, atol=1e-3)

    print("KERNEL_OK")
</pallas_src>

<mosaic_0001>
module attributes {stable_mosaic.version = 11 : i64} {
  func.func @mlp_kernel(%arg0: i32, %arg1: memref<8x784xbf16, #tpu.memory_space<vmem>>, %arg2: memref<784x128xbf16, #tpu.memory_space<vmem>>, %arg3: memref<1x128xf32, #tpu.memory_space<vmem>>, %arg4: memref<128x128xbf16, #tpu.memory_space<vmem>>, %arg5: memref<1x128xf32, #tpu.memory_space<vmem>>, %arg6: memref<128x128xbf16, #tpu.memory_space<vmem>>, %arg7: memref<1x128xf32, #tpu.memory_space<vmem>>, %arg8: memref<128x128xbf16, #tpu.memory_space<vmem>>, %arg9: memref<1x128xf32, #tpu.memory_space<vmem>>, %arg10: memref<8x128xf32, #tpu.memory_space<vmem>>) attributes {dimension_semantics = [#tpu.dimension_semantics<parallel>], iteration_bounds = array<i64: 1>, scalar_prefetch = 0 : i64, scratch_operands = 0 : i64, tpu.core_type = #tpu.core_type<tc>, window_params = [{transform_indices = @transform_0, window_bounds = array<i64: 8, 784>}, {pipeline_mode = #tpu.pipeline_mode<synchronous>, transform_indices = @transform_1, window_bounds = array<i64: 784, 128>}, {pipeline_mode = #tpu.pipeline_mode<synchronous>, transform_indices = @transform_2, window_bounds = array<i64: 1, 128>}, {pipeline_mode = #tpu.pipeline_mode<synchronous>, transform_indices = @transform_3, window_bounds = array<i64: 128, 128>}, {pipeline_mode = #tpu.pipeline_mode<synchronous>, transform_indices = @transform_4, window_bounds = array<i64: 1, 128>}, {pipeline_mode = #tpu.pipeline_mode<synchronous>, transform_indices = @transform_5, window_bounds = array<i64: 128, 128>}, {pipeline_mode = #tpu.pipeline_mode<synchronous>, transform_indices = @transform_6, window_bounds = array<i64: 1, 128>}, {pipeline_mode = #tpu.pipeline_mode<synchronous>, transform_indices = @transform_7, window_bounds = array<i64: 128, 128>}, {pipeline_mode = #tpu.pipeline_mode<synchronous>, transform_indices = @transform_8, window_bounds = array<i64: 1, 128>}, {transform_indices = @transform_9, window_bounds = array<i64: 8, 128>}]} {
    %c0 = arith.constant 0 : index
    %c0_0 = arith.constant 0 : index
    %0 = vector.load %arg1[%c0, %c0_0] : memref<8x784xbf16, #tpu.memory_space<vmem>>, vector<8x784xbf16>
    %c0_1 = arith.constant 0 : index
    %c0_2 = arith.constant 0 : index
    %1 = vector.load %arg2[%c0_1, %c0_2] : memref<784x128xbf16, #tpu.memory_space<vmem>>, vector<784x128xbf16>
    %cst = arith.constant dense<0.000000e+00> : vector<8x128xf32>
    %2 = tpu.matmul %0, %1, %cst {dimension_numbers = #tpu.dot_dimension_numbers<[1], [0], [0], [1], [0, 0, 1, 1], [], []>} : vector<8x784xbf16>, vector<784x128xbf16>, vector<8x128xf32> -> vector<8x128xf32>
    %c0_3 = arith.constant 0 : index
    %c0_4 = arith.constant 0 : index
    %3 = vector.load %arg3[%c0_3, %c0_4] : memref<1x128xf32, #tpu.memory_space<vmem>>, vector<1x128xf32>
    %4 = vector.broadcast %3 : vector<1x128xf32> to vector<8x128xf32>
    %5 = arith.addf %2, %4 : vector<8x128xf32>
    %cst_5 = arith.constant 0.000000e+00 : f32
    %6 = vector.broadcast %cst_5 : f32 to vector<8x128xf32>
    %7 = arith.maximumf %5, %6 : vector<8x128xf32>
    %8 = arith.truncf %7 : vector<8x128xf32> to vector<8x128xbf16>
    %c0_6 = arith.constant 0 : index
    %c0_7 = arith.constant 0 : index
    %9 = vector.load %arg4[%c0_6, %c0_7] : memref<128x128xbf16, #tpu.memory_space<vmem>>, vector<128x128xbf16>
    %cst_8 = arith.constant dense<0.000000e+00> : vector<8x128xf32>
    %10 = tpu.matmul %8, %9, %cst_8 {dimension_numbers = #tpu.dot_dimension_numbers<[1], [0], [0], [1], [0, 0, 1, 1], [], []>} : vector<8x128xbf16>, vector<128x128xbf16>, vector<8x128xf32> -> vector<8x128xf32>
    %c0_9 = arith.constant 0 : index
    %c0_10 = arith.constant 0 : index
    %11 = vector.load %arg5[%c0_9, %c0_10] : memref<1x128xf32, #tpu.memory_space<vmem>>, vector<1x128xf32>
    %12 = vector.broadcast %11 : vector<1x128xf32> to vector<8x128xf32>
    %13 = arith.addf %10, %12 : vector<8x128xf32>
    %cst_11 = arith.constant 0.000000e+00 : f32
    %14 = vector.broadcast %cst_11 : f32 to vector<8x128xf32>
    %15 = arith.maximumf %13, %14 : vector<8x128xf32>
    %16 = arith.truncf %15 : vector<8x128xf32> to vector<8x128xbf16>
    %c0_12 = arith.constant 0 : index
    %c0_13 = arith.constant 0 : index
    %17 = vector.load %arg6[%c0_12, %c0_13] : memref<128x128xbf16, #tpu.memory_space<vmem>>, vector<128x128xbf16>
    %cst_14 = arith.constant dense<0.000000e+00> : vector<8x128xf32>
    %18 = tpu.matmul %16, %17, %cst_14 {dimension_numbers = #tpu.dot_dimension_numbers<[1], [0], [0], [1], [0, 0, 1, 1], [], []>} : vector<8x128xbf16>, vector<128x128xbf16>, vector<8x128xf32> -> vector<8x128xf32>
    %c0_15 = arith.constant 0 : index
    %c0_16 = arith.constant 0 : index
    %19 = vector.load %arg7[%c0_15, %c0_16] : memref<1x128xf32, #tpu.memory_space<vmem>>, vector<1x128xf32>
    %20 = vector.broadcast %19 : vector<1x128xf32> to vector<8x128xf32>
    %21 = arith.addf %18, %20 : vector<8x128xf32>
    %cst_17 = arith.constant 0.000000e+00 : f32
    %22 = vector.broadcast %cst_17 : f32 to vector<8x128xf32>
    %23 = arith.maximumf %21, %22 : vector<8x128xf32>
    %24 = arith.truncf %23 : vector<8x128xf32> to vector<8x128xbf16>
    %c0_18 = arith.constant 0 : index
    %c0_19 = arith.constant 0 : index
    %25 = vector.load %arg8[%c0_18, %c0_19] : memref<128x128xbf16, #tpu.memory_space<vmem>>, vector<128x128xbf16>
    %cst_20 = arith.constant dense<0.000000e+00> : vector<8x128xf32>
    %26 = tpu.matmul %24, %25, %cst_20 {dimension_numbers = #tpu.dot_dimension_numbers<[1], [0], [0], [1], [0, 0, 1, 1], [], []>} : vector<8x128xbf16>, vector<128x128xbf16>, vector<8x128xf32> -> vector<8x128xf32>
    %c0_21 = arith.constant 0 : index
    %c0_22 = arith.constant 0 : index
    %27 = vector.load %arg9[%c0_21, %c0_22] : memref<1x128xf32, #tpu.memory_space<vmem>>, vector<1x128xf32>
    %28 = vector.broadcast %27 : vector<1x128xf32> to vector<8x128xf32>
    %29 = arith.addf %26, %28 : vector<8x128xf32>
    %cst_23 = arith.constant dense<0xFF800000> : vector<8xf32>
    %30 = vector.multi_reduction <maximumf>, %29, %cst_23 [1] : vector<8x128xf32> to vector<8xf32>
    %31 = vector.shape_cast %30 : vector<8xf32> to vector<8x1xf32>
    %32 = vector.broadcast %31 : vector<8x1xf32> to vector<8x128xf32>
    %33 = arith.subf %29, %32 : vector<8x128xf32>
    %34 = math.exp %33 : vector<8x128xf32>
    %cst_24 = arith.constant dense<0.000000e+00> : vector<8xf32>
    %35 = vector.multi_reduction <add>, %34, %cst_24 [1] : vector<8x128xf32> to vector<8xf32>
    %36 = vector.shape_cast %35 : vector<8xf32> to vector<8x1xf32>
    %37 = math.log %36 : vector<8x1xf32>
    %38 = vector.broadcast %37 : vector<8x1xf32> to vector<8x128xf32>
    %39 = arith.subf %33, %38 : vector<8x128xf32>
    %c0_25 = arith.constant 0 : index
    %c0_26 = arith.constant 0 : index
    %40 = vector.load %arg10[%c0_25, %c0_26] : memref<8x128xf32, #tpu.memory_space<vmem>>, vector<8x128xf32>
    tpu.vector_store %arg10[%c0_25, %c0_26], %39 {strides = array<i32>} : memref<8x128xf32, #tpu.memory_space<vmem>>, vector<8x128xf32>,
    return
  }
  func.func @transform_0(%arg0: i32) -> (i32, i32) {
    %c0_i32 = arith.constant 0 : i32
    %c0_i32_0 = arith.constant 0 : i32
    return %arg0, %c0_i32 : i32, i32
  }
  func.func @transform_1(%arg0: i32) -> (i32, i32) {
    %c0_i32 = arith.constant 0 : i32
    %c0_i32_0 = arith.constant 0 : i32
    %c0_i32_1 = arith.constant 0 : i32
    return %c0_i32, %c0_i32_0 : i32, i32
  }
  func.func @transform_2(%arg0: i32) -> (i32, i32) {
    %c0_i32 = arith.constant 0 : i32
    %c0_i32_0 = arith.constant 0 : i32
    %c0_i32_1 = arith.constant 0 : i32
    return %c0_i32, %c0_i32_0 : i32, i32
  }
  func.func @transform_3(%arg0: i32) -> (i32, i32) {
    %c0_i32 = arith.constant 0 : i32
    %c0_i32_0 = arith.constant 0 : i32
    %c0_i32_1 = arith.constant 0 : i32
    return %c0_i32, %c0_i32_0 : i32, i32
  }
  func.func @transform_4(%arg0: i32) -> (i32, i32) {
    %c0_i32 = arith.constant 0 : i32
    %c0_i32_0 = arith.constant 0 : i32
    %c0_i32_1 = arith.constant 0 : i32
    return %c0_i32, %c0_i32_0 : i32, i32
  }
  func.func @transform_5(%arg0: i32) -> (i32, i32) {
    %c0_i32 = arith.constant 0 : i32
    %c0_i32_0 = arith.constant 0 : i32
    %c0_i32_1 = arith.constant 0 : i32
    return %c0_i32, %c0_i32_0 : i32, i32
  }
  func.func @transform_6(%arg0: i32) -> (i32, i32) {
    %c0_i32 = arith.constant 0 : i32
    %c0_i32_0 = arith.constant 0 : i32
    %c0_i32_1 = arith.constant 0 : i32
    return %c0_i32, %c0_i32_0 : i32, i32
  }
  func.func @transform_7(%arg0: i32) -> (i32, i32) {
    %c0_i32 = arith.constant 0 : i32
    %c0_i32_0 = arith.constant 0 : i32
    %c0_i32_1 = arith.constant 0 : i32
    return %c0_i32, %c0_i32_0 : i32, i32
  }
  func.func @transform_8(%arg0: i32) -> (i32, i32) {
    %c0_i32 = arith.constant 0 : i32
    %c0_i32_0 = arith.constant 0 : i32
    %c0_i32_1 = arith.constant 0 : i32
    return %c0_i32, %c0_i32_0 : i32, i32
  }
  func.func @transform_9(%arg0: i32) -> (i32, i32) {
    %c0_i32 = arith.constant 0 : i32
    %c0_i32_0 = arith.constant 0 : i32
    return %arg0, %c0_i32 : i32, i32
  }
}

</mosaic_0001>

<bundles_post_ra>
// kernel: net_forward.1
= control target key start
LH: loop header
LB: loop body
LE: loop exit
PB: predicated region body
PF: predicated region fallthrough
CT: control target
= control target key end

     0   :  { %v1344_v43 = vmov 0.0   ;;  %vm1345_vm0 = vmmov 0   ;;  %vm461_vm1 = vcmask 130048   ;;  %s1676_s0 = inlined_call_operand.vmem [shape: bf16[8,784], index: 0, kind: input, shape index: {}]   ;;  %s1677_s1 = inlined_call_operand.vmem [shape: bf16[784,128], index: 1, kind: input, shape index: {}]   ;;  %s1678_s2 = inlined_call_operand.vmem [shape: f32[1,128], index: 2, kind: input, shape index: {}]   ;;  %s1679_s3 = inlined_call_operand.vmem [shape: bf16[128,128], index: 3, kind: input, shape index: {}]   ;;  %s1680_s4 = inlined_call_operand.vmem [shape: f32[1,128], index: 4, kind: input, shape index: {}]   ;;  %s1681_s5 = inlined_call_operand.vmem [shape: bf16[128,128], index: 5, kind: input, shape index: {}]   ;;  %s1682_s6 = inlined_call_operand.vmem [shape: f32[1,128], index: 6, kind: input, shape index: {}]   ;;  %s1683_s7 = inlined_call_operand.vmem [shape: bf16[128,128], index: 7, kind: input, shape index: {}]   ;;  %s1684_s8 = inlined_call_operand.vmem [shape: f32[1,128], index: 8, kind: input, shape index: {}]   ;;  %s1685_s9 = inlined_call_operand.hbm [shape: f32[8,128], index: 9, kind: output, shape index: {}]  }
   0x1   :  { %v1238_v0 = vld [vmem:[%s1677_s1 + $0x78] sm:$0xff]   ;;  %v1242_v4 = vld [vmem:[%s1677_s1 + $0x70] sm:$0xff]   ;;  %v1246_v8 = vld [vmem:[%s1677_s1 + $0x68] sm:$0xff]  }
   0x2   :  { %v1239_v1 = vld [vmem:[%s1677_s1 + $0x38] sm:$0xff]   ;;  %1074 = vmatprep.subr.bf16.mxu0 %v1238_v0  ;;  %v1243_v5 = vld [vmem:[%s1677_s1 + $0x30] sm:$0xff]   ;;  %v1247_v9 = vld [vmem:[%s1677_s1 + $0x28] sm:$0xff]  }
   0x3   :  { %v1240_v2 = vld [vmem:[%s1677_s1 + $0xf8] sm:$0xff]   ;;  %1075 = vmatpush3.bf16.msra.mxu0 %v1239_v1  ;;  %v1244_v6 = vld [vmem:[%s1677_s1 + $0xf0] sm:$0xff]   ;;  %v1248_v10 = vld [vmem:[%s1677_s1 + $0xe8] sm:$0xff]  }
   0x4   :  { %v1241_v3 = vld [vmem:[%s1677_s1 + $0xb8] sm:$0xff]   ;;  %1096 = vmatprep.subr.bf16.mxu1 %v1240_v2  ;;  %1076 = vmatprep.subr.bf16.mxu0 %v1242_v4  ;;  %v1245_v7 = vld [vmem:[%s1677_s1 + $0xb0] sm:$0xff]   ;;  %v1249_v11 = vld [vmem:[%s1677_s1 + $0xa8] sm:$0xff]  }
   0x5   :  { %1097 = vmatpush3.bf16.msra.mxu1 %v1241_v3  ;;  %v1250_v12 = vld [vmem:[%s1677_s1 + $0x60] sm:$0xff]   ;;  %v1254_v16 = vld [vmem:[%s1677_s1 + $0x58] sm:$0xff]   ;;  %v1258_v20 = vld [vmem:[%s1677_s1 + $0x50] sm:$0xff]  }
   0x6   :  { %1098 = vmatprep.subr.bf16.mxu1 %v1244_v6  ;;  %v1251_v13 = vld [vmem:[%s1677_s1 + $0x20] sm:$0xff]   ;;  %v1255_v17 = vld [vmem:[%s1677_s1 + $0x18] sm:$0xff]   ;;  %v1259_v21 = vld [vmem:[%s1677_s1 + $0x10] sm:$0xff]  }
   0x7   :  { %1077 = vmatpush3.bf16.msra.mxu0 %v1243_v5  ;;  %v1252_v14 = vld [vmem:[%s1677_s1 + $0xe0] sm:$0xff]   ;;  %v1256_v18 = vld [vmem:[%s1677_s1 + $0xd8] sm:$0xff]   ;;  %v1260_v22 = vld [vmem:[%s1677_s1 + $0xd0] sm:$0xff]  }
   0x8   :  { %1078 = vmatprep.subr.bf16.mxu0 %v1246_v8  ;;  %v1253_v15 = vld [vmem:[%s1677_s1 + $0xa0] sm:$0xff]   ;;  %v1257_v19 = vld [vmem:[%s1677_s1 + $0x98] sm:$0xff]   ;;  %v1261_v23 = vld [vmem:[%s1677_s1 + $0x90] sm:$0xff]  }
   0x9   :  { %1099 = vmatpush3.bf16.msra.mxu1 %v1245_v7  ;;  %v1262_v24 = vld [vmem:[%s1677_s1 + $0x48] sm:$0xff]   ;;  %v1266_v28 = vld [vmem:[%s1677_s1 + $0x40] sm:$0xff]   ;;  %v1272_v35 = vld [vmem:[%s1677_s1 + $0x178] sm:$0xff]  }
   0xa   :  { %1100 = vmatprep.subr.bf16.mxu1 %v1248_v10  ;;  %v1263_v25 = vld [vmem:[%s1677_s1 + $0x8] sm:$0xff]   ;;  %v1267_v29 = vld [vmem:[%s1677_s1] sm:$0xff]   ;;  %v1275_v39 = vld [vmem:[%s1677_s1 + $0x138] sm:$0xff]  }
   0xb   :  { %1079 = vmatpush3.bf16.msra.mxu0 %v1247_v9  ;;  %v1264_v26 = vld [vmem:[%s1677_s1 + $0xc8] sm:$0xff]   ;;  %v1268_v30 = vld [vmem:[%s1677_s1 + $0xc0] sm:$0xff]   ;;  %v1276_v40 = vld [vmem:[%s1677_s1 + $0x170] sm:$0xff]  }
   0xc   :  { %1080 = vmatprep.subr.bf16.mxu0 %v1250_v12  ;;  %v1265_v27 = vld [vmem:[%s1677_s1 + $0x88] sm:$0xff]   ;;  %v34_v31 = vld [vmem:[%s1676_s0] sm:$0xff]  ;;  %v1277_v41 = vld [vmem:[%s1677_s1 + $0x130] sm:$0xff]  }
   0xd   :  { %1101 = vmatpush3.bf16.msra.mxu1 %v1249_v11  ;;  %v990_v32 = vcombine.low %v34_v31, %v34_v31  ;;  %v991_v33 = vcombine.high %v34_v31, %v34_v31  ;;  %v1271_v34 = vld [vmem:[%s1677_s1 + $0x80] sm:$0xff]   ;;  %v35_v36 = vld [vmem:[%s1676_s0 + $0x8] sm:$0xff]  ;;  %v1282_v47 = vld [vmem:[%s1677_s1 + $0x158] sm:$0xff]  }
   0xe   :  { %1102 = vmatprep.subr.bf16.mxu1 %v1252_v14  ;;  %v992_v37 = vcombine.low %v35_v36, %v35_v36  ;;  %v993_v38 = vcombine.high %v35_v36, %v35_v36  ;;  %v1278_v42 = vld [vmem:[%s1677_s1 + $0x168] sm:$0xff]   ;;  %v1280_v45 = vld [vmem:[%s1677_s1 + $0x160] sm:$0xff]   ;;  %v1283_v48 = vld [vmem:[%s1677_s1 + $0x118] sm:$0xff]  }
   0xf   :  { %1081 = vmatpush3.bf16.msra.mxu0 %v1251_v13  ;;  %497 = vmatprep.mubr.bf16.mxu0 %v991_v33  ;;  %v1279_v44 = vld [vmem:[%s1677_s1 + $0x128] sm:$0xff]   ;;  %v1281_v46 = vld [vmem:[%s1677_s1 + $0x120] sm:$0xff]   ;;  %v1284_v49 = vld [vmem:[%s1677_s1 + $0x150] sm:$0xff]  }
  0x10   :  { %1082 = vmatprep.subr.bf16.mxu0 %v1254_v16  ;;  %537 = vmatprep.mubr.bf16.mxu1 %v993_v38  ;;  %v1290_v50 = vld [vmem:[%s1677_s1 + $0x180] sm:$0xff]   ;;  %v36_v51 = vld [vmem:[%s1676_s0 + $0x10] sm:$0xff]  ;;  %v1293_v54 = vld [vmem:[%s1676_s0 + $0x18] ss:$0 sps:$4 sm:$0xff]  }
  0x11   :  { %1103 = vmatpush3.bf16.msra.mxu1 %v1253_v15  ;;  %v1285_v52 = vld [vmem:[%s1677_s1 + $0x110] sm:$0xff]   ;;  %v995_v53 = vcombine.high %v36_v51, %v36_v51  ;;  %v1286_v55 = vld [vmem:[%s1677_s1 + $0x148] sm:$0xff]   ;;  %v1288_v57 = vld [vmem:[%s1677_s1 + $0x140] sm:$0xff]   ;;  %v994_v59 = vcombine.low %v36_v51, %v36_v51 }
  0x12   :  { %1104 = vmatprep.subr.bf16.mxu1 %v1256_v18  ;;  %v1287_v56 = vld [vmem:[%s1677_s1 + $0x108] sm:$0xff]   ;;  %v1289_v58 = vld [vmem:[%s1677_s1 + $0x100] sm:$0xff]  }
  0x13   :  { %1083 = vmatpush3.bf16.msra.mxu0 %v1255_v17 }
  0x14   :  { %1084 = vmatprep.subr.bf16.mxu0 %v1258_v20 }
  0x15   :  { %1105 = vmatpush3.bf16.msra.mxu1 %v1257_v19 }
  0x16   :  { %1106 = vmatprep.subr.bf16.mxu1 %v1260_v22 }
  0x17   :  { %1085 = vmatpush3.bf16.msra.mxu0 %v1259_v21 }
  0x18   :  { %1086 = vmatprep.subr.bf16.mxu0 %v1262_v24 }
  0x19   :  { %1107 = vmatpush3.bf16.msra.mxu1 %v1261_v23 }
  0x1a   :  { %1108 = vmatprep.subr.bf16.mxu1 %v1264_v26 }
  0x1b   :  { %1087 = vmatpush3.bf16.msra.mxu0 %v1263_v25 }
  0x1c   :  { %1088 = vmatprep.subr.bf16.mxu0 %v1266_v28 }
  0x1d   :  { %1109 = vmatpush3.bf16.msra.mxu1 %v1265_v27 }
  0x1e   :  { %1110 = vmatprep.subr.bf16.mxu1 %v1268_v30 }
  0x1f   :  { %1089 = vmatpush3.bf16.msra.mxu0 %v1267_v29 }
  0x20   :  { %1118 = vmatprep.subr.bf16.mxu0 %v1272_v35 }
  0x21   :  { %1111 = vmatpush3.bf16.msra.mxu1 %v1271_v34 }
  0x22   :  { %498 = vmatmul.mubr.bf16.vlgmr.msra.gmra.mxu0 %v990_v32  ;;  %1169 = vmatprep.subr.bf16.mxu1 %v1344_v43 }
  0x23   :  { %1119 = vmatpush3.bf16.msra.mxu0 %v1275_v39  ;;  %577 = vmatprep.mubr.bf16.mxu0 %v995_v53 }
  0x24   :  { %538 = vmatmul.mubr.bf16.vlgmr.msra.gmra.mxu1 %v992_v37  ;;  %1120 = vmatprep.subr.bf16.mxu0 %v1276_v40 }
  0x25   :  { %1171 = vmatprep.mubr.msk.bf16.mxu1 %vm1345_vm0, %v1344_v43  ;;  %1170 = vmatpush3.bf16.msra.mxu1 %v1290_v50 }
  0x26   :  { %1175 = vmatprep.subr.bf16.mxu1 %v1344_v43 }
  0x27   :  { %1121 = vmatpush3.bf16.msra.mxu0 %v1277_v41 }
  0x28   :  { %1122 = vmatprep.subr.bf16.mxu0 %v1278_v42 }
  0x2b   :  { %1123 = vmatpush3.bf16.msra.mxu0 %v1279_v44 }
  0x2c   :  { %1124 = vmatprep.subr.bf16.mxu0 %v1280_v45  ;;  %1172 = vmatmul.mubr.msk.bf16.vlgmr.msra.gmra.mxu1 %vm461_vm1, %v1293_v54 }
  0x2d   :  { %1191 = vmatprep.mubr.msk.bf16.mxu1 %vm1345_vm0, %v1344_v43 }
  0x2f   :  { %1125 = vmatpush3.bf16.msra.mxu0 %v1281_v46 }
  0x30   :  { %1126 = vmatprep.subr.bf16.mxu0 %v1282_v47 }
  0x33   :  { %1127 = vmatpush3.bf16.msra.mxu0 %v1283_v48 }
  0x34   :  { %1128 = vmatprep.subr.bf16.mxu0 %v1284_v49 }
  0x37   :  { %1129 = vmatpush3.bf16.msra.mxu0 %v1285_v52 }
  0x38   :  { %1130 = vmatprep.subr.bf16.mxu0 %v1286_v55 }
  0x3b   :  { %1131 = vmatpush3.bf16.msra.mxu0 %v1287_v56 }
  0x3c   :  { %1132 = vmatprep.subr.bf16.mxu0 %v1288_v57 }
  0x3f   :  { %1133 = vmatpush3.bf16.msra.mxu0 %v1289_v58 }
  0x40   :  { %1195 = vmatprep.subr.bf16.mxu0 %v1344_v43 }
  0x41   :  { %14 = vsyncpa [#allocation3], 0  ;;  %v1294_v60 = vld [vmem:[%s1679_s3 + $0x38] sm:$0xff]   ;;  %v1295_v61 = vld [vmem:[%s1679_s3 + $0x30] sm:$0xff]  }
  0x42   :  { %578 = vmatmul.mubr.bf16.vlgmr.msra.gmra.mxu0 %v994_v59  ;;  %1176 = vmatpush3.bf16.msra.mxu1 %v1294_v60  ;;  %v1296_v62 = vld [vmem:[%s1679_s3 + $0x28] sm:$0xff]   ;;  %v1297_v63 = vld [vmem:[%s1679_s3 + $0x20] sm:$0xff]   ;;  %v1298_v0 = vld [vmem:[%s1679_s3 + $0x18] sm:$0xff]  }
  0x43   :  { %1211 = vmatprep.mubr.msk.bf16.mxu0 %vm1345_vm0, %v1344_v43  ;;  %1177 = vmatprep.subr.bf16.mxu1 %v1344_v43  ;;  %v1299_v1 = vld [vmem:[%s1679_s3 + $0x10] sm:$0xff]   ;;  %v1300_v2 = vld [vmem:[%s1679_s3 + $0x8] sm:$0xff]   ;;  %v1301_v3 = vld [vmem:[%s1679_s3] sm:$0xff]  }
  0x44   :  { %v1302_v4 = vld [vmem:[%s1681_s5 + $0x38] sm:$0xff]   ;;  %v1303_v5 = vld [vmem:[%s1681_s5 + $0x30] sm:$0xff]   ;;  %v1304_v6 = vld [vmem:[%s1681_s5 + $0x28] sm:$0xff]  }
  0x45   :  { %1196 = vmatpush3.bf16.msra.mxu0 %v1302_v4  ;;  %v1305_v7 = vld [vmem:[%s1681_s5 + $0x20] sm:$0xff]   ;;  %v1306_v8 = vld [vmem:[%s1681_s5 + $0x18] sm:$0xff]   ;;  %v1307_v9 = vld [vmem:[%s1681_s5 + $0x10] sm:$0xff]  }
  0x46   :  { %1178 = vmatpush3.bf16.msra.mxu1 %v1295_v61  ;;  %1197 = vmatprep.subr.bf16.mxu0 %v1344_v43  ;;  %v989_v23 = vld [vmem:[%s1678_s2] ss:$0 sm:$0xff]  ;;  %v1308_v36 = vld [vmem:[%s1681_s5 + $0x8] sm:$0xff]   ;;  %v1310_v38 = vld [vmem:[%s1683_s7 + $0x38] sm:$0xff]  }
  0x47   :  { %1179 = vmatprep.subr.bf16.mxu1 %v1344_v43  ;;  %v1309_v37 = vld [vmem:[%s1681_s5] sm:$0xff]   ;;  %v1311_v39 = vld [vmem:[%s1683_s7 + $0x30] sm:$0xff]   ;;  %v1312_v40 = vld [vmem:[%s1683_s7 + $0x28] sm:$0xff]  }
  0x48   :  { %v1313_v41 = vld [vmem:[%s1683_s7 + $0x20] sm:$0xff]   ;;  %v1314_v42 = vld [vmem:[%s1683_s7 + $0x18] sm:$0xff]   ;;  %v1315_v44 = vld [vmem:[%s1683_s7 + $0x10] sm:$0xff]  }
  0x49   :  { %1198 = vmatpush3.bf16.msra.mxu0 %v1303_v5  ;;  %v1047_v45 = vld [vmem:[%s1680_s4] ss:$0 sm:$0xff]  ;;  %v1316_v53 = vld [vmem:[%s1683_s7 + $0x8] sm:$0xff]  }
  0x4a   :  { %1180 = vmatpush3.bf16.msra.mxu1 %v1296_v62  ;;  %1199 = vmatprep.subr.bf16.mxu0 %v1344_v43  ;;  %v1317_v54 = vld [vmem:[%s1683_s7] sm:$0xff]  }
  0x4b   :  { %1181 = vmatprep.subr.bf16.mxu1 %v1344_v43  ;;  %v1056_v55 = vld [vmem:[%s1682_s6] ss:$0 sm:$0xff]  ;;  %s1346_s6 = smov [#allocation2]  }
  0x4c   :  { %s981_s7 = sshll.u32 %s1346_s6, 4  ;;  %s982_s7 = int_to_ptr.vmem [resolvable:$true] %s981_s7 }
  0x4d   :  { %1200 = vmatpush3.bf16.msra.mxu0 %v1304_v6  ;;  %p1327_p1 = scmp.lt.s32.totalorder %s982_s7, %s982_s7 }
  0x4e   :  { %1182 = vmatpush3.bf16.msra.mxu1 %v1297_v63  ;;  %1201 = vmatprep.subr.bf16.mxu0 %v1344_v43 }
  0x4f   :  { %1183 = vmatprep.subr.bf16.mxu1 %v1344_v43 }
  0x51   :  { %1202 = vmatpush3.bf16.msra.mxu0 %v1305_v7 }
  0x52   :  { %1184 = vmatpush3.bf16.msra.mxu1 %v1298_v0  ;;  %1203 = vmatprep.subr.bf16.mxu0 %v1344_v43 }
  0x53   :  { %1185 = vmatprep.subr.bf16.mxu1 %v1344_v43 }
  0x55   :  { %1204 = vmatpush3.bf16.msra.mxu0 %v1306_v8 }
  0x56   :  { %1186 = vmatpush3.bf16.msra.mxu1 %v1299_v1  ;;  %1205 = vmatprep.subr.bf16.mxu0 %v1344_v43 }
  0x57   :  { %1187 = vmatprep.subr.bf16.mxu1 %v1344_v43 }
  0x59   :  { %1206 = vmatpush3.bf16.msra.mxu0 %v1307_v9 }
  0x5a   :  { %1188 = vmatpush3.bf16.msra.mxu1 %v1300_v2  ;;  %1207 = vmatprep.subr.bf16.mxu0 %v1344_v43 }
  0x5b   :  { %1189 = vmatprep.subr.bf16.mxu1 %v1344_v43 }
  0x5d   :  { %1208 = vmatpush3.bf16.msra.mxu0 %v1308_v36 }
  0x5e   :  { %1190 = vmatpush3.bf16.msra.mxu1 %v1301_v3  ;;  %1209 = vmatprep.subr.bf16.mxu0 %v1344_v43 }
  0x5f   :  { %1215 = vmatprep.subr.bf16.mxu1 %v1344_v43 }
  0x61   :  { %1210 = vmatpush3.bf16.msra.mxu0 %v1309_v37 }
  0xe2   :  { %v1090_v10 = vpop.f32.mrf.mxu0 }
  0xe4   :  { %v1091_v11 = vpop.f32.mrf.mxu0  ;;  %v1112_v12 = vpop.f32.mrf.mxu1 }
  0xe5   :  { %v1092_v22 = vadd.f32 %v1091_v11, %v1090_v10 }
  0xe6   :  { %v1093_v13 = vpop.f32.mrf.mxu0  ;;  %v1113_v14 = vpop.f32.mrf.mxu1 }
  0xe7   :  { %v500_v24 = vadd.f32 %v1092_v22, %v989_v23  ;;  %v1114_v25 = vadd.f32 %v1113_v14, %v1112_v12 }
  0xe8   :  { %v1094_v15 = vpop.f32.mrf.mxu0  ;;  %v1115_v16 = vpop.f32.mrf.mxu1 }
  0xe9   :  { %v540_v28 = vadd.f32 %v1114_v25, %v500_v24 }
  0xea   :  { %v1116_v17 = vpop.f32.mrf.mxu1 }
  0xec   :  { %v619_v18 = vpop.f32.mrf.mxu1 }
  0xee   :  { %v1173_v19 = vpop.f32.mrf.mxu1 }
  0xf0   :  { %v622_v20 = vpop.f32.mrf.mxu1 }
  0xf2   :  { %v1174_v21 = vpop.f32.mrf.mxu1 }
 0x102   :  { %v1134_v26 = vpop.f32.mrf.mxu0 }
 0x104   :  { %v1135_v27 = vpop.f32.mrf.mxu0 }
 0x105   :  { %v1136_v29 = vadd.f32 %v1135_v27, %v1134_v26 }
 0x106   :  { %v1137_v30 = vpop.f32.mrf.mxu0 }
 0x107   :  { %v580_v31 = vadd.f32 %v1136_v29, %v540_v28 }
 0x108   :  { %v1138_v32 = vpop.f32.mrf.mxu0 }
 0x109   :  { %v620_v33 = vadd.f32 %v619_v18, %v580_v31 }
 0x10b   :  { %v625_v34 = vmax.f32 %v620_v33, 0.0 }
 0x10d   :  { %v626_v35 = vpack.c.bf16 %v625_v34, %v625_v34 }
 0x10f   :  { %1192 = vmatmul.mubr.bf16.vlgmr.msra.gmra.mxu1 %v626_v35 }
 0x110   :  { %1231 = vmatprep.mubr.msk.bf16.mxu1 %vm1345_vm0, %v1344_v43  ;;  %1216 = vmatpush3.bf16.msra.mxu1 %v1310_v38 }
 0x111   :  { %1217 = vmatprep.subr.bf16.mxu1 %v1344_v43 }
 0x114   :  { %1218 = vmatpush3.bf16.msra.mxu1 %v1311_v39 }
 0x115   :  { %1219 = vmatprep.subr.bf16.mxu1 %v1344_v43 }
 0x118   :  { %1220 = vmatpush3.bf16.msra.mxu1 %v1312_v40 }
 0x119   :  { %1221 = vmatprep.subr.bf16.mxu1 %v1344_v43 }
 0x11c   :  { %1222 = vmatpush3.bf16.msra.mxu1 %v1313_v41 }
 0x11d   :  { %1223 = vmatprep.subr.bf16.mxu1 %v1344_v43 }
 0x120   :  { %1224 = vmatpush3.bf16.msra.mxu1 %v1314_v42 }
 0x121   :  { %1225 = vmatprep.subr.bf16.mxu1 %v1344_v43 }
 0x124   :  { %1226 = vmatpush3.bf16.msra.mxu1 %v1315_v44 }
 0x125   :  { %1227 = vmatprep.subr.bf16.mxu1 %v1344_v43 }
 0x128   :  { %1228 = vmatpush3.bf16.msra.mxu1 %v1316_v53 }
 0x129   :  { %1229 = vmatprep.subr.bf16.mxu1 %v1344_v43  ;;  %v1065_v43 = vld [vmem:[%s1684_s8] ss:$0 sm:$0xff]  ;;  %s1322_s8 = scalar_lea.vmem %s982_s7, 128 }
 0x12a   :  { %p1323_p0 = scmp.ne.s32.totalorder %s982_s7, %s1322_s8  ;;  %p1328_p2 = scmp.lt.s32.totalorder %s1322_s8, %s1322_s8 }
 0x12c   :  { %1230 = vmatpush3.bf16.msra.mxu1 %v1317_v54  ;;  %p1329_p3 = por %p1328_p2, %p1327_p1 }
 0x12e   :  { %p1330_p4 = pnand %p1329_p3, %p1323_p0 }
 0x1cf   :  { %v732_v46 = vpop.f32.mrf.mxu1 }
 0x1d0   :  { %v733_v47 = vadd.f32 %v1047_v45, %v732_v46 }
 0x1d1   :  { %v1193_v48 = vpop.f32.mrf.mxu1 }
 0x1d2   :  { %v738_v49 = vmax.f32 %v733_v47, 0.0 }
 0x1d3   :  { %v735_v50 = vpop.f32.mrf.mxu1 }
 0x1d4   :  { %v739_v51 = vpack.c.bf16 %v738_v49, %v738_v49 }
 0x1d5   :  { %v1194_v52 = vpop.f32.mrf.mxu1 }
 0x1d6   :  { %1212 = vmatmul.mubr.bf16.vlgmr.msra.gmra.mxu0 %v739_v51 }
 0x296   :  { %v845_v56 = vpop.f32.mrf.mxu0 }
 0x297   :  { %v846_v57 = vadd.f32 %v1056_v55, %v845_v56 }
 0x298   :  { %v1213_v58 = vpop.f32.mrf.mxu0 }
 0x299   :  { %v851_v59 = vmax.f32 %v846_v57, 0.0 }
 0x29a   :  { %v848_v60 = vpop.f32.mrf.mxu0 }
 0x29b   :  { %v852_v61 = vpack.c.bf16 %v851_v59, %v851_v59 }
 0x29c   :  { %v1214_v62 = vpop.f32.mrf.mxu0 }
 0x29d   :  { %1232 = vmatmul.mubr.bf16.vlgmr.msra.gmra.mxu1 %v852_v61 }
 0x35d   :  { %v958_v63 = vpop.f32.mrf.mxu1 }
 0x35e   :  { %v959_v0 = vadd.f32 %v1065_v43, %v958_v63 }
 0x35f   :  { %v1233_v1 = vpop.f32.mrf.mxu1 }
 0x360   :  { %964 = vmax.xlane.f32.xlu0 %v959_v0 }
 0x361   :  { %v961_v2 = vpop.f32.mrf.mxu1 }
 0x363   :  { %v1234_v3 = vpop.f32.mrf.mxu1 }
 0x3e9   :  { %v965_v4 = vpop.xlane.xlu0 %964 }
 0x3ea   :  { %v966_v5 = vsub.f32 %v959_v0, %v965_v4 }
 0x3ec   :  { %v967_v6 = vmul.f32 1.442695, %v966_v5 }
 0x3ee   :  { %1318 = vpow2.f32 %v967_v6 }
 0x3fb   :  { %v1319_v7 = vpop.eup %1318 }
 0x3fc   :  { %969 = vadd.xlane.f32.xlu0 %v1319_v7 }
 0x485   :  { %v970_v8 = vpop.xlane.xlu0 %969 }
 0x486   :  { %1320 = vlog2.f32 %v970_v8 }
 0x493   :  { %v1321_v9 = vpop.eup %1320 }
 0x494   :  { %v972_v10 = vmul.f32 0.6931472, %v1321_v9 }
 0x496   :  { %v973_v11 = vsub.f32 %v966_v5, %v972_v10 }
 0x498   :  { %974 = vst [vmem:[#allocation2] sm:$0xff] %v973_v11 }
 0x499   :  { %1333 = shalt.err (!%p1330_p4)
}
 0x49a   :  { %984 = dma.vmem_to_hbm [thread:$0]  %s982_s7, 128, %s1685_s9, [#allocation3]  }
 0x49b   :  { %1342 = dma.done.wait [#allocation3], 128  }
 0x49c   :  { %1343 = vsyncadd [#allocation3], 4294967168 }
 0x49d   :  { %988 = vsyncpa [#allocation3], 1 }

</bundles_post_ra>
